<compile_context>
chip_gen: v7x
topology: tpu7x:2x2x1
jax: 0.10.0
libtpu: 0.0.40
codegen_flags: <defaults>
</compile_context>

<pallas_src>
import math

import jax
import jax.numpy as jnp
from jax.experimental import pallas as pl
from jax.experimental.pallas import tpu as pltpu


# ----------------------------------------------------------------------------
# Kernels
# ----------------------------------------------------------------------------
def _lastbn_stats_kernel(x_ref, wt_ref, sum_ref, sq_ref, sum_acc, sq_acc):
    """Pass 1: z = x @ W^T (no bias); accumulate per-channel sum(z), sum(z*z).

    Grid is (ncore, inner): the leading axis is "parallel" (v7x megacore) and
    the inner axis walks this core's M tiles.  Partial results land in row `p`
    of the (ncore, C) outputs; the wrapper combines them.  Zero-padded rows of
    x contribute exactly zero because the bias is excluded here, so there is
    no row mask in the hot loop.
    """
    i = pl.program_id(1)

    @pl.when(i == 0)
    def _init():
        sum_acc[...] = jnp.zeros_like(sum_acc)
        sq_acc[...] = jnp.zeros_like(sq_acc)

    z = jnp.dot(x_ref[...], wt_ref[...], preferred_element_type=jnp.float32)
    sum_acc[...] += jnp.sum(z, axis=0, keepdims=True)
    sq_acc[...] += jnp.sum(z * z, axis=0, keepdims=True)

    @pl.when(i == pl.num_programs(1) - 1)
    def _finalize():
        sum_ref[...] = sum_acc[...]
        sq_ref[...] = sq_acc[...]


def _lastbn_apply_kernel(x_ref, wt_ref, shift_ref, scale_ref, o_ref):
    """Pass 2 / eval: out = (x @ W^T + shift) * scale.

    shift = bias - mean and scale = 1/(var + eps) are (1, C) f32 rows, so the
    normalization is a broadcast add + multiply after the MXU matmul; the
    reciprocal is computed once in the wrapper (not per element).
    """
    z = jnp.dot(x_ref[...], wt_ref[...], preferred_element_type=jnp.float32)
    o_ref[...] = ((z + shift_ref[...]) * scale_ref[...]).astype(o_ref.dtype)


# ----------------------------------------------------------------------------
# Wrapper
# ----------------------------------------------------------------------------
def _round_up(a, b):
    return (a + b - 1) // b * b


def _cdiv(a, b):
    return (a + b - 1) // b


def _vmem_capacity_bytes():
    """Physical VMEM per core; fall back to the smallest (v7x: 64 MiB)."""
    try:
        cap = int(pltpu.get_tpu_info().vmem_capacity_bytes)
        if cap > 0:
            return max(cap, 32 * 1024 * 1024)
    except Exception:
        pass
    return 64 * 1024 * 1024


def last_batch_norm(x, weight, bias, running_mean, running_var, *,
                    momentum=0.99, eps=1e-4, training=True,
                    prefer_bf16_matmul=False):
    """Forward pass of LastBatchNorm (affine=True).

    x:            (..., C) channels-last
    weight:       (C, C)   nn.Linear weight
    bias:         (C,)     nn.Linear bias
    running_mean: (C,)
    running_var:  (C,)

    Training returns (y, new_mean, new_var); eval returns y.
    """
    *lead, c = x.shape
    m = math.prod(lead) if lead else 1
    in_dtype = x.dtype

    # ---- channel padding: lane-dense (128) when overhead <= ~33%, else 8 ----
    c128 = _round_up(c, 128)
    if c128 != c and (c128 - c) * 3 <= c:
        c_p = c128
    elif c % 8 != 0:
        c_p = _round_up(c, 8)
    else:
        c_p = c
    pad_c = c_p - c

    # ---- matmul input dtype (optional bf16 for large, MXU-bound C) ----------
    mm_dtype = in_dtype
    if prefer_bf16_matmul and in_dtype == jnp.float32 and c_p >= 512:
        mm_dtype = jnp.bfloat16
    mm_item = jnp.dtype(mm_dtype).itemsize
    out_item = jnp.dtype(in_dtype).itemsize

    # ---- operands built once in the wrapper ---------------------------------
    wt = weight.T.astype(mm_dtype)                       # (C, C) = W^T
    if pad_c:
        wt = jnp.pad(wt, ((0, pad_c), (0, pad_c)))

    def _row(v, pad_val=0.0):
        r = v.reshape(1, c).astype(jnp.float32)
        if pad_c:
            r = jnp.pad(r, ((0, 0), (0, pad_c)), constant_values=pad_val)
        return r

    b_row = _row(bias)
    rm_row = _row(running_mean)
    rv_row = _row(running_var, pad_val=1.0)

    # ---- VMEM budget (footprint-derived, generation-aware) ------------------
    phys_vmem = _vmem_capacity_bytes()
    budget = min(int(phys_vmem * 0.7), 96 * 1024 * 1024)
    headroom = 2 * 1024 * 1024

    w_bytes = c_p * c_p * mm_item
    big_w = w_bytes > 4 * 1024 * 1024
    w_bufs = 1 if big_w else 2          # Buffered(1) single-buffers a large W
    w_vmem = w_bufs * w_bytes

    def _w_spec(imap):
        if big_w:
            try:
                return pl.BlockSpec((c_p, c_p), imap, pipeline_mode=pl.Buffered(1))
            except TypeError:           # older jax without pipeline_mode kwarg
                pass
        return pl.BlockSpec((c_p, c_p), imap)

    def _pick_tm(per_row_bytes):
        avail = budget - w_vmem - headroom
        tm = avail // max(per_row_bytes, 1)
        return max(8, min(8192, (tm // 8) * 8))

    def _vmem_limit(footprint):
        return max(32 * 1024 * 1024,
                   min(int(phys_vmem * 0.9), footprint + 8 * 1024 * 1024))

    # rows: pad M to a sublane multiple; padded rows are zero.
    m8 = _round_up(max(m, 1), 8)
    x2 = x.reshape(m, c).astype(mm_dtype)

    # x tile + out tile, both double-buffered
    tm_apply = _pick_tm(2 * c_p * (mm_item + out_item))

    def _apply(x_pad, m_rows, shift, scale):
        """out = (x @ W^T + shift) * scale, tiled over M, 'parallel'."""
        tm2 = min(tm_apply, m_rows)
        grid = (_cdiv(m_rows, tm2),)
        foot = w_vmem + 2 * tm2 * c_p * (mm_item + out_item) + 8 * c_p * 4
        return pl.pallas_call(
            _lastbn_apply_kernel,
            out_shape=jax.ShapeDtypeStruct((m_rows, c_p), in_dtype),
            grid=grid,
            in_specs=[pl.BlockSpec((tm2, c_p), lambda i: (i, 0)),
                      _w_spec(lambda i: (0, 0)),
                      pl.BlockSpec((1, c_p), lambda i: (0, 0)),
                      pl.BlockSpec((1, c_p), lambda i: (0, 0))],
            out_specs=pl.BlockSpec((tm2, c_p), lambda i: (i, 0)),
            compiler_params=pltpu.CompilerParams(
                dimension_semantics=("parallel",),
                vmem_limit_bytes=_vmem_limit(foot)),
            cost_estimate=pl.CostEstimate(
                flops=2 * m_rows * c_p * c_p + 2 * m_rows * c_p,
                transcendentals=0,
                bytes_accessed=m_rows * c_p * (mm_item + out_item) + w_bytes),
        )(x_pad, wt, shift, scale)

    # =========================== eval mode ===================================
    if not training:
        m_final = m8
        if m_final > m or pad_c:
            x2 = jnp.pad(x2, ((0, m_final - m), (0, pad_c)))
        shift = b_row - rm_row
        scale = 1.0 / (rv_row + eps)
        y_pad = _apply(x2, m_final, shift, scale)
        return y_pad[:m, :c].reshape(*lead, c)

    # ========================= training mode =================================
    # --- pass 1: per-channel sum / sum-of-squares of z = x @ W^T -------------
    # Split the M tiles across a leading size-2 "parallel" axis so both v7x
    # TensorCores produce partial sums (combined in the wrapper below).
    tm_stats_max = _pick_tm(2 * c_p * mm_item)
    if m8 <= tm_stats_max:
        ncore, inner, tm1 = 1, 1, m8
    else:
        ncore = 2
        inner = max(1, _cdiv(m8, ncore * tm_stats_max))
        tm1 = _round_up(_cdiv(m8, ncore * inner), 8)
    m_final = ncore * inner * tm1
    if m_final > m or pad_c:
        x2 = jnp.pad(x2, ((0, m_final - m), (0, pad_c)))

    foot1 = w_vmem + 2 * tm1 * c_p * mm_item + 8 * c_p * 4
    psum, psq = pl.pallas_call(
        _lastbn_stats_kernel,
        out_shape=(jax.ShapeDtypeStruct((ncore, c_p), jnp.float32),
                   jax.ShapeDtypeStruct((ncore, c_p), jnp.float32)),
        grid=(ncore, inner),
        in_specs=[pl.BlockSpec((tm1, c_p), lambda p, i: (p * inner + i, 0)),
                  _w_spec(lambda p, i: (0, 0))],
        out_specs=(pl.BlockSpec((1, c_p), lambda p, i: (p, 0)),
                   pl.BlockSpec((1, c_p), lambda p, i: (p, 0))),
        scratch_shapes=[pltpu.VMEM((1, c_p), jnp.float32),
                        pltpu.VMEM((1, c_p), jnp.float32)],
        compiler_params=pltpu.CompilerParams(
            dimension_semantics=("parallel", "arbitrary"),
            vmem_limit_bytes=_vmem_limit(foot1)),
        cost_estimate=pl.CostEstimate(
            flops=2 * m_final * c_p * c_p + 4 * m_final * c_p,
            transcendentals=0,
            bytes_accessed=m_final * c_p * mm_item + w_bytes + 2 * ncore * c_p * 4),
    )(x2, wt)

    # --- combine / finalize: tiny (C,)-sized math between the two passes -----
    # Padded rows are zero and the bias is excluded from z, so the partial
    # sums are exact for the true M rows; fold the bias in analytically.
    mf = jnp.float32(m)
    sum_z = jnp.sum(psum, axis=0, keepdims=True)            # (1, C)
    sq_z = jnp.sum(psq, axis=0, keepdims=True)
    mean_z = sum_z / mf
    # unbiased variance (matches torch.Tensor.var default, correction=1)
    # TODO(synk): single-pass sum-of-squares loses precision when |mean| >> std
    # at very large M; switch to a shifted/Welford combine if that matters.
    var = (sq_z - mf * mean_z * mean_z) / (mf - 1.0)
    mean_y = mean_z + b_row
    new_mean = mean_y * (1.0 - momentum) + rm_row * momentum
    new_var = var * (1.0 - momentum) + rv_row * momentum
    shift = b_row - new_mean
    scale = 1.0 / (new_var + eps)

    # --- pass 2: recompute the affine transform and normalize ----------------
    y_pad = _apply(x2, m_final, shift, scale)
    y_out = y_pad[:m, :c].reshape(*lead, c)
    return y_out, new_mean[0, :c], new_var[0, :c]


# ----------------------------------------------------------------------------
# Pure-JAX reference (mirrors the PyTorch module)
# ----------------------------------------------------------------------------
def _ref_train(x, w, b, rm, rv, momentum, eps):
    y = jnp.einsum("...i,oi->...o", x, w) + b
    yf = y.reshape(-1, y.shape[-1])
    mean = yf.mean(axis=0)
    var = yf.var(axis=0, ddof=1)
    new_mean = mean * (1.0 - momentum) + rm * momentum
    new_var = var * (1.0 - momentum) + rv * momentum
    y_out = (y - new_mean) / (new_var + eps)
    return y_out, new_mean, new_var


def _ref_eval(x, w, b, rm, rv, eps):
    y = jnp.einsum("...i,oi->...o", x, w) + b
    return (y - rm) / (rv + eps)


if __name__ == "__main__":
    CHANNELS = 32
    MOMENTUM = 0.99
    EPS = 1e-4

    key = jax.random.PRNGKey(0)
    kx, kw, kb = jax.random.split(key, 3)

    # input: (batch=2, seq=8, hidden=CHANNELS), channels-last
    x = jax.random.normal(kx, (2, 8, CHANNELS), dtype=jnp.float32)

    # deterministic nn.Linear(channels, channels) init: U(-1/sqrt(C), 1/sqrt(C))
    bound = 1.0 / (CHANNELS ** 0.5)
    weight = jax.random.uniform(kw, (CHANNELS, CHANNELS), jnp.float32, -bound, bound)
    bias = jax.random.uniform(kb, (CHANNELS,), jnp.float32, -bound, bound)

    # registered buffers: mean=zeros, var=ones
    running_mean = jnp.zeros((CHANNELS,), jnp.float32)
    running_var = jnp.ones((CHANNELS,), jnp.float32)

    # training mode
    y, new_mean, new_var = last_batch_norm(
        x, weight, bias, running_mean, running_var,
        momentum=MOMENTUM, eps=EPS, training=True)
    jax.block_until_ready((y, new_mean, new_var))

    y_ref, mean_ref, var_ref = _ref_train(
        x, weight, bias, running_mean, running_var, MOMENTUM, EPS)
    assert jnp.allclose(y, y_ref, atol=1e-4, rtol=1e-4), "output mismatch"
    assert jnp.allclose(new_mean, mean_ref, atol=1e-5, rtol=1e-5), "mean mismatch"
    assert jnp.allclose(new_var, var_ref, atol=1e-5, rtol=1e-5), "var mismatch"

    # eval mode (running stats applied via the same apply kernel)
    y_eval = last_batch_norm(
        x, weight, bias, running_mean, running_var,
        momentum=MOMENTUM, eps=EPS, training=False)
    jax.block_until_ready(y_eval)
    y_eval_ref = _ref_eval(x, weight, bias, running_mean, running_var, EPS)
    assert jnp.allclose(y_eval, y_eval_ref, atol=1e-4, rtol=1e-4), "eval mismatch"

    print("KERNEL_OK")
</pallas_src>

<mosaic_0001>
module attributes {stable_mosaic.version = 11 : i64} {
  func.func @_lastbn_stats_kernel(%arg0: i32, %arg1: i32, %arg2: memref<16x32xf32, #tpu.memory_space<vmem>>, %arg3: memref<32x32xf32, #tpu.memory_space<vmem>>, %arg4: memref<1x32xf32, #tpu.memory_space<vmem>>, %arg5: memref<1x32xf32, #tpu.memory_space<vmem>>, %arg6: memref<1x32xf32, #tpu.memory_space<vmem>>, %arg7: memref<1x32xf32, #tpu.memory_space<vmem>>) attributes {dimension_semantics = [#tpu.dimension_semantics<parallel>, #tpu.dimension_semantics<arbitrary>], iteration_bounds = array<i64: 1, 1>, scalar_prefetch = 0 : i64, scratch_operands = 2 : i64, tpu.core_type = #tpu.core_type<tc>, window_params = [{transform_indices = @transform_0, window_bounds = array<i64: 16, 32>}, {pipeline_mode = #tpu.pipeline_mode<synchronous>, transform_indices = @transform_1, window_bounds = array<i64: 32, 32>}, {transform_indices = @transform_2, window_bounds = array<i64: 1, 32>}, {transform_indices = @transform_3, window_bounds = array<i64: 1, 32>}]} {
    %c0_i32 = arith.constant 0 : i32
    %0 = arith.cmpi eq, %arg1, %c0_i32 : i32
    %1 = arith.extui %0 : i1 to i32
    %c0_i32_0 = arith.constant 0 : i32
    %2 = arith.cmpi ne, %1, %c0_i32_0 : i32
    scf.if %2 {
      %cst_16 = arith.constant 0.000000e+00 : f32
      %20 = vector.broadcast %cst_16 : f32 to vector<1x32xf32>
      %c0_17 = arith.constant 0 : index
      %c0_18 = arith.constant 0 : index
      %21 = vector.load %arg6[%c0_17, %c0_18] : memref<1x32xf32, #tpu.memory_space<vmem>>, vector<1x32xf32>
      tpu.vector_store %arg6[%c0_17, %c0_18], %20 {strides = array<i32>} : memref<1x32xf32, #tpu.memory_space<vmem>>, vector<1x32xf32>,
      %cst_19 = arith.constant 0.000000e+00 : f32
      %22 = vector.broadcast %cst_19 : f32 to vector<1x32xf32>
      %c0_20 = arith.constant 0 : index
      %c0_21 = arith.constant 0 : index
      %23 = vector.load %arg7[%c0_20, %c0_21] : memref<1x32xf32, #tpu.memory_space<vmem>>, vector<1x32xf32>
      tpu.vector_store %arg7[%c0_20, %c0_21], %22 {strides = array<i32>} : memref<1x32xf32, #tpu.memory_space<vmem>>, vector<1x32xf32>,
    } else {
    }
    %c0 = arith.constant 0 : index
    %c0_1 = arith.constant 0 : index
    %3 = vector.load %arg2[%c0, %c0_1] : memref<16x32xf32, #tpu.memory_space<vmem>>, vector<16x32xf32>
    %c0_2 = arith.constant 0 : index
    %c0_3 = arith.constant 0 : index
    %4 = vector.load %arg3[%c0_2, %c0_3] : memref<32x32xf32, #tpu.memory_space<vmem>>, vector<32x32xf32>
    %cst = arith.constant dense<0.000000e+00> : vector<16x32xf32>
    %5 = tpu.matmul %3, %4, %cst {dimension_numbers = #tpu.dot_dimension_numbers<[1], [0], [0], [1], [0, 0, 1, 1], [], []>} : vector<16x32xf32>, vector<32x32xf32>, vector<16x32xf32> -> vector<16x32xf32>
    %c0_4 = arith.constant 0 : index
    %c0_5 = arith.constant 0 : index
    %6 = vector.load %arg6[%c0_4, %c0_5] : memref<1x32xf32, #tpu.memory_space<vmem>>, vector<1x32xf32>
    %cst_6 = arith.constant dense<0.000000e+00> : vector<32xf32>
    %7 = vector.multi_reduction <add>, %5, %cst_6 [0] : vector<16x32xf32> to vector<32xf32>
    %8 = vector.shape_cast %7 : vector<32xf32> to vector<1x32xf32>
    %9 = arith.addf %6, %8 : vector<1x32xf32>
    %c0_7 = arith.constant 0 : index
    %c0_8 = arith.constant 0 : index
    %10 = vector.load %arg6[%c0_7, %c0_8] : memref<1x32xf32, #tpu.memory_space<vmem>>, vector<1x32xf32>
    tpu.vector_store %arg6[%c0_7, %c0_8], %9 {strides = array<i32>} : memref<1x32xf32, #tpu.memory_space<vmem>>, vector<1x32xf32>,
    %c0_9 = arith.constant 0 : index
    %c0_10 = arith.constant 0 : index
    %11 = vector.load %arg7[%c0_9, %c0_10] : memref<1x32xf32, #tpu.memory_space<vmem>>, vector<1x32xf32>
    %12 = arith.mulf %5, %5 : vector<16x32xf32>
    %cst_11 = arith.constant dense<0.000000e+00> : vector<32xf32>
    %13 = vector.multi_reduction <add>, %12, %cst_11 [0] : vector<16x32xf32> to vector<32xf32>
    %14 = vector.shape_cast %13 : vector<32xf32> to vector<1x32xf32>
    %15 = arith.addf %11, %14 : vector<1x32xf32>
    %c0_12 = arith.constant 0 : index
    %c0_13 = arith.constant 0 : index
    %16 = vector.load %arg7[%c0_12, %c0_13] : memref<1x32xf32, #tpu.memory_space<vmem>>, vector<1x32xf32>
    tpu.vector_store %arg7[%c0_12, %c0_13], %15 {strides = array<i32>} : memref<1x32xf32, #tpu.memory_space<vmem>>, vector<1x32xf32>,
    %c0_i32_14 = arith.constant 0 : i32
    %17 = arith.cmpi eq, %arg1, %c0_i32_14 : i32
    %18 = arith.extui %17 : i1 to i32
    %c0_i32_15 = arith.constant 0 : i32
    %19 = arith.cmpi ne, %18, %c0_i32_15 : i32
    scf.if %19 {
      %c0_16 = arith.constant 0 : index
      %c0_17 = arith.constant 0 : index
      %20 = vector.load %arg6[%c0_16, %c0_17] : memref<1x32xf32, #tpu.memory_space<vmem>>, vector<1x32xf32>
      %c0_18 = arith.constant 0 : index
      %c0_19 = arith.constant 0 : index
      %21 = vector.load %arg4[%c0_18, %c0_19] : memref<1x32xf32, #tpu.memory_space<vmem>>, vector<1x32xf32>
      tpu.vector_store %arg4[%c0_18, %c0_19], %20 {strides = array<i32>} : memref<1x32xf32, #tpu.memory_space<vmem>>, vector<1x32xf32>,
      %c0_20 = arith.constant 0 : index
      %c0_21 = arith.constant 0 : index
      %22 = vector.load %arg7[%c0_20, %c0_21] : memref<1x32xf32, #tpu.memory_space<vmem>>, vector<1x32xf32>
      %c0_22 = arith.constant 0 : index
      %c0_23 = arith.constant 0 : index
      %23 = vector.load %arg5[%c0_22, %c0_23] : memref<1x32xf32, #tpu.memory_space<vmem>>, vector<1x32xf32>
      tpu.vector_store %arg5[%c0_22, %c0_23], %22 {strides = array<i32>} : memref<1x32xf32, #tpu.memory_space<vmem>>, vector<1x32xf32>,
    } else {
    }
    return
  }
  func.func @transform_0(%arg0: i32, %arg1: i32) -> (i32, i32) {
    %c1_i32 = arith.constant 1 : i32
    %0 = arith.muli %arg0, %c1_i32 : i32
    %1 = arith.addi %0, %arg1 : i32
    %c0_i32 = arith.constant 0 : i32
    %c0_i32_0 = arith.constant 0 : i32
    return %1, %c0_i32 : i32, i32
  }
  func.func @transform_1(%arg0: i32, %arg1: i32) -> (i32, i32) {
    %c0_i32 = arith.constant 0 : i32
    %c0_i32_0 = arith.constant 0 : i32
    %c0_i32_1 = arith.constant 0 : i32
    return %c0_i32, %c0_i32_0 : i32, i32
  }
  func.func @transform_2(%arg0: i32, %arg1: i32) -> (i32, i32) {
    %c0_i32 = arith.constant 0 : i32
    %c0_i32_0 = arith.constant 0 : i32
    return %arg0, %c0_i32 : i32, i32
  }
  func.func @transform_3(%arg0: i32, %arg1: i32) -> (i32, i32) {
    %c0_i32 = arith.constant 0 : i32
    %c0_i32_0 = arith.constant 0 : i32
    return %arg0, %c0_i32 : i32, i32
  }
}

</mosaic_0001>

<bundles_post_ra>
// kernel: tpu_custom_call.1
= control target key start
LH: loop header
LB: loop body
LE: loop exit
PB: predicated region body
PF: predicated region fallthrough
CT: control target
= control target key end

     0   :  { %9 = vsyncpa [#allocation5], 0  ;;  %s433_s0 = inlined_call_operand.hbm [shape: f32[16,32], index: 0, kind: input, shape index: {}]   ;;  %s434_s1 = inlined_call_operand.hbm [shape: f32[32,32], index: 1, kind: input, shape index: {}]   ;;  %s435_s2 = inlined_call_operand.hbm [shape: f32[1,32], index: 2, kind: output, shape index: {0}]   ;;  %s436_s3 = inlined_call_operand.hbm [shape: f32[1,32], index: 3, kind: output, shape index: {1}]  }
   0x1   :  { %10 = vsyncpa [#allocation8], 0 }
   0x2   :  { %11 = vsyncpa [#allocation6], 0 }
   0x3   :  { %12 = vsyncpa [#allocation11], 0  ;;  %s338_s12 = smov [#allocation4]   ;;  %s242_s16 = scalar_lea.hbm %s433_s0, 256 }
   0x4   :  { %s22_s13 = sshll.u32 %s338_s12, 4  ;;  %p243_p0 = scmp.ne.s32.totalorder %s433_s0, %s242_s16  ;;  %s23_s13 = int_to_ptr.vmem [resolvable:$true] %s22_s13 }
   0x5   :  { %p246_p1 = scmp.lt.u32.totalorder %s242_s16, %s433_s0 }
   0x7   :  { %p248_p2 = pnand %p246_p1, %p243_p0 }
   0x9   :  { %251 = shalt.err (!%p248_p2)
}
   0xa   :  { %s252_s21 = scalar_lea.vmem %s23_s13, 256  ;;  %p257_p4 = scmp.lt.s32.totalorder %s23_s13, %s23_s13 }
   0xb   :  { %p253_p3 = scmp.ne.s32.totalorder %s23_s13, %s252_s21  ;;  %p258_p5 = scmp.lt.s32.totalorder %s252_s21, %s252_s21 }
   0xd   :  { %p259_p6 = por %p258_p5, %p257_p4 }
   0xf   :  { %p260_p7 = pnand %p259_p6, %p253_p3 }
  0x11   :  { %263 = shalt.err (!%p260_p7)
}
  0x12   :  { %s339_s22 = smov 128   ;;  %s340_s23 = smov 8  }
  0x13   :  { %28 = dma.hbm_to_vmem [thread:$0]  %s433_s0, 256, %s23_s13, [#allocation5], %s339_s22, %s339_s22, %s340_s23  }
  0x14   :  { %s341_s26 = smov [#allocation7]   ;;  %s264_s30 = scalar_lea.hbm %s434_s1, 512 }
  0x15   :  { %s34_s27 = sshll.u32 %s341_s26, 4  ;;  %p265_p8 = scmp.ne.s32.totalorder %s434_s1, %s264_s30  ;;  %s35_s27 = int_to_ptr.vmem [resolvable:$true] %s34_s27 }
  0x16   :  { %p268_p9 = scmp.lt.u32.totalorder %s264_s30, %s434_s1 }
  0x18   :  { %p270_p10 = pnand %p268_p9, %p265_p8 }
  0x1a   :  { %273 = shalt.err (!%p270_p10)
}
  0x1b   :  { %s274_s8 = scalar_lea.vmem %s35_s27, 512  ;;  %p279_p12 = scmp.lt.s32.totalorder %s35_s27, %s35_s27 }
  0x1c   :  { %p275_p11 = scmp.ne.s32.totalorder %s35_s27, %s274_s8  ;;  %p280_p13 = scmp.lt.s32.totalorder %s274_s8, %s274_s8 }
  0x1e   :  { %p281_p0 = por %p280_p13, %p279_p12 }
  0x20   :  { %p282_p1 = pnand %p281_p0, %p275_p11 }
  0x22   :  { %285 = shalt.err (!%p282_p1)
}
  0x23   :  { %40 = dma.hbm_to_vmem [thread:$0]  %s434_s1, 512, %s35_s27, [#allocation8], %s339_s22, %s339_s22, %s340_s23  }
  0x24   :  { %330 = dma.done.wait [#allocation5], 256  }
  0x25   :  { %331 = vsyncadd [#allocation5], 4294967040 }
  0x26   :  { %332 = dma.done.wait [#allocation8], 512  }
  0x27   :  { %333 = vsyncadd [#allocation8], 4294966784  ;;  %vm62_vm0 = vcmask 261120   ;;  %v58_v0 = vld [vmem:[#allocation7] sm:$0xff]  ;;  %v59_v1 = vld [vmem:[#allocation7 + $0x8] sm:$0xff]  ;;  %vm53_vm1 = vcmask 253952  }
  0x28   :  { %v60_v2 = vld [vmem:[#allocation7 + $0x10] sm:$0xff]  ;;  %v227_v3 = vpack.c.bf16 %v59_v1, %v58_v0  ;;  %v61_v4 = vld [vmem:[#allocation7 + $0x18] sm:$0xff]  ;;  %v342_v8 = vmov 0.0   ;;  %s343_s1 = smov [#allocation9]   ;;  %s344_s11 = smov [#allocation10]  }
  0x29   :  { %v56_v5 = vld [vmem:[#allocation4] sm:$0xff]  ;;  %v231_v6 = vpack.c.bf16 %v61_v4, %v60_v2  ;;  %v57_v7 = vld [vmem:[#allocation4 + $0x8] sm:$0xff]  ;;  %54 = vst.msk [vmem:[#allocation2] sm:$0x1] %vm53_vm1, %v342_v8  ;;  %55 = vst.msk [vmem:[#allocation3] sm:$0x1] %vm53_vm1, %v342_v8 }
  0x2a   :  { %224 = vmatprep.mubr.msk.f32.mxu0 %vm62_vm0, %v56_v5  ;;  %228 = vmatprep.subr.bf16.mxu0 %v227_v3  ;;  %s184_s10 = sshll.u32 %s343_s1, 4  ;;  %s194_s12 = sshll.u32 %s344_s11, 4  ;;  %s185_s10 = int_to_ptr.vmem [resolvable:$true] %s184_s10  ;;  %s400_s12 = int_to_ptr.vmem [resolvable:$true] %s194_s12 }
  0x2b   :  { %230 = vmatpush3.bf16.msra.mxu0 %v227_v3  ;;  %s286_s13 = scalar_lea.vmem %s185_s10, 16  ;;  %s290_s14 = scalar_lea.vmem %s185_s10, 32 }
  0x2c   :  { %232 = vmatprep.subr.bf16.mxu0 %v231_v6  ;;  %p287_p2 = scmp.ne.s32.totalorder %s185_s10, %s286_s13  ;;  %p291_p3 = scmp.lt.s32.totalorder %s185_s10, %s185_s10 }
  0x2d   :  { %p292_p4 = scmp.lt.s32.totalorder %s290_s14, %s286_s13 }
  0x2f   :  { %234 = vmatpush3.bf16.msra.mxu0 %v231_v6  ;;  %p293_p5 = por %p292_p4, %p291_p3 }
  0x30   :  { %v144_v28 = vld [vmem:[#allocation2] sm:$0x1]  ;;  %v157_v31 = vld [vmem:[#allocation3] sm:$0x1] }
  0x31   :  { %p294_p6 = pnand %p293_p5, %p287_p2 }
  0x32   :  { %225 = vmatmul.mubr.msk.f32.vlgmr.msra.gmra.mrb[0].mxu0 %vm62_vm0, %v57_v7 }
 0x105   :  { %v226_v9 = vpop.f32.mrb[0].mxu0 }
 0x106   :  { %v146_v10 = vsel %vm62_vm0, %v226_v9, 0.0  ;;  %v159_v11 = vmul.f32 %v226_v9, %v226_v9  ;;  %v135_v12 = vpop.f32.mrb[1].mxu0 }
 0x107   :  { %v145_v13 = vsel %vm62_vm0, %v135_v12, 0.0  ;;  %v158_v14 = vmul.f32 %v135_v12, %v135_v12 }
 0x108   :  { %v161_v15 = vsel %vm62_vm0, %v159_v11, 0.0  ;;  %v147_v16 = vadd.f32 %v146_v10, %v145_v13 }
 0x109   :  { %v160_v17 = vsel %vm62_vm0, %v158_v14, 0.0 }
 0x10a   :  { %v148_v18 = vrot.slane %v147_v16, 4  ;;  %v162_v19 = vadd.f32 %v161_v15, %v160_v17 }
 0x10c   :  { %v149_v20 = vadd.f32 %v148_v18, %v147_v16  ;;  %v163_v21 = vrot.slane %v162_v19, 4 }
 0x10e   :  { %v150_v22 = vrot.slane %v149_v20, 2  ;;  %v164_v23 = vadd.f32 %v163_v21, %v162_v19 }
 0x110   :  { %v151_v24 = vadd.f32 %v150_v22, %v149_v20  ;;  %v165_v25 = vrot.slane %v164_v23, 2 }
 0x112   :  { %v152_v26 = vrot.slane %v151_v24, 1  ;;  %v166_v27 = vadd.f32 %v165_v25, %v164_v23 }
 0x114   :  { %v153_v29 = vadd.f32 %v152_v26, %v151_v24  ;;  %v167_v30 = vrot.slane %v166_v27, 1 }
 0x116   :  { %v154_v32 = vadd.f32 %v153_v29, %v144_v28  ;;  %v168_v33 = vadd.f32 %v167_v30, %v166_v27 }
 0x118   :  { %156 = vst.msk [vmem:[#allocation2] sm:$0x1] %vm53_vm1, %v154_v32  ;;  %v169_v34 = vadd.f32 %v168_v33, %v157_v31 }
 0x11a   :  { %170 = vst.msk [vmem:[#allocation3] sm:$0x1] %vm53_vm1, %v169_v34 }
 0x11f   :  { %v174_v35 = vld [vmem:[#allocation2] sm:$0x1] }
 0x120   :  { %175 = vst.msk [vmem:[#allocation9] sm:$0x1] %vm53_vm1, %v174_v35 }
 0x121   :  { %297 = shalt.err (!%p294_p6)
}
 0x122   :  { %s298_s17 = scalar_lea.hbm %s435_s2, 16 }
 0x123   :  { %p299_p7 = scmp.ne.s32.totalorder %s435_s2, %s298_s17  ;;  %p302_p8 = scmp.lt.u32.totalorder %s298_s17, %s435_s2 }
 0x125   :  { %p304_p9 = pnand %p302_p8, %p299_p7 }
 0x127   :  { %307 = shalt.err (!%p304_p9)
}
 0x128   :  { %187 = dma.vmem_to_hbm [thread:$0]  %s185_s10, 16, %s435_s2, [#allocation6]   ;;  %v176_v36 = vld [vmem:[#allocation3] sm:$0x1] }
 0x129   :  { %177 = vst.msk [vmem:[#allocation10] sm:$0x1] %vm53_vm1, %v176_v36  ;;  %s308_s24 = scalar_lea.vmem %s400_s12, 16  ;;  %s312_s25 = scalar_lea.vmem %s400_s12, 32 }
 0x12a   :  { %p309_p10 = scmp.ne.s32.totalorder %s400_s12, %s308_s24  ;;  %p313_p11 = scmp.lt.s32.totalorder %s400_s12, %s400_s12 }
 0x12b   :  { %p314_p12 = scmp.lt.s32.totalorder %s312_s25, %s308_s24 }
 0x12d   :  { %p315_p13 = por %p314_p12, %p313_p11 }
 0x12f   :  { %p316_p0 = pnand %p315_p13, %p309_p10 }
 0x131   :  { %319 = shalt.err (!%p316_p0)
}
 0x132   :  { %s320_s28 = scalar_lea.hbm %s436_s3, 16 }
 0x133   :  { %p321_p1 = scmp.ne.s32.totalorder %s436_s3, %s320_s28  ;;  %p324_p2 = scmp.lt.u32.totalorder %s320_s28, %s436_s3 }
 0x135   :  { %p326_p3 = pnand %p324_p2, %p321_p1 }
 0x137   :  { %329 = shalt.err (!%p326_p3)
}
 0x138   :  { %197 = dma.vmem_to_hbm [thread:$0]  %s400_s12, 16, %s436_s3, [#allocation11]  }
 0x139   :  { %334 = dma.done.wait [#allocation6], 16  }
 0x13a   :  { %335 = vsyncadd [#allocation6], 4294967280 }
 0x13b   :  { %336 = dma.done.wait [#allocation11], 16  }
 0x13c   :  { %337 = vsyncadd [#allocation11], 4294967280 }
 0x13d   :  { %204 = vsyncpa [#allocation5], 1 }
 0x13e   :  { %205 = vsyncpa [#allocation8], 1 }
 0x13f   :  { %206 = vsyncpa [#allocation6], 1 }
 0x140   :  { %207 = vsyncpa [#allocation11], 1 }

</bundles_post_ra>
